<compile_context>
chip_gen: v6e
topology: v6e:2x2x1
jax: 0.10.0
libtpu: 0.0.40
codegen_flags: <defaults>
</compile_context>

<pallas_src>
import jax
import jax.numpy as jnp
from jax.experimental import pallas as pl
from jax.experimental.pallas import tpu as pltpu


def _round_up(x, m):
    return ((x + m - 1) // m) * m


def _device_kind():
    try:
        return jax.devices()[0].device_kind.lower()
    except Exception:
        return ""


def _default_act_dtype():
    """bf16 bias+ReLU epilogue on chips with a bf16 VPU (v6e/v7x); f32 on v5-."""
    kind = _device_kind()
    if any(t in kind for t in ("v2", "v3", "v4", "v5")):
        return jnp.float32
    return jnp.bfloat16


def _num_tensorcores():
    """2 TensorCores per chip on v7x; 1 on v5e/v6e (best-effort detection)."""
    return 2 if "7" in _device_kind() else 1


def _make_mlp_kernel(act_dtype):
    def mlp_kernel(x_ref,
                   w1, b1, w2, b2, w3, b3, w4, b4, w5, b5, w6, b6, w7, b7,
                   out_ref):
        """Fused transposed MLP on one (len_x, TILE_B) batch tile.

        Weights are (out, in); activations are (features, TILE_B); the output
        block is (1, TILE_B) so the final store is a full unmasked lane-dense vst.
        """
        h = x_ref[...]                                       # (len_x, TILE_B) f32

        def dense_relu(h, w_ref, b_ref):
            # bf16 MXU inputs, f32 accumulation; bias + ReLU in `act_dtype`.
            y = jnp.dot(w_ref[...], h.astype(jnp.bfloat16),
                        preferred_element_type=jnp.float32)
            y = y.astype(act_dtype) + b_ref[...]
            return jnp.maximum(y, 0)

        h = dense_relu(h, w1, b1)   # len_x -> 64
        h = dense_relu(h, w2, b2)   # 64    -> 128
        h = dense_relu(h, w3, b3)   # 128   -> 64
        h = dense_relu(h, w4, b4)   # 64    -> 32
        h = dense_relu(h, w5, b5)   # 32    -> 16
        h = dense_relu(h, w6, b6)   # 16    -> 8
        # Final layer (8 -> 1), no activation; already lane-dense (1, TILE_B).
        y = jnp.dot(w7[...], h.astype(jnp.bfloat16),
                    preferred_element_type=jnp.float32) + b7[...]
        out_ref[...] = y.astype(out_ref.dtype)

    return mlp_kernel


def pack_params(params, act_dtype=jnp.float32):
    """Master f32 params (W stored (in, out), b (out,)) -> kernel argument layout.

    Layers 1-6: W^T (out, in) bf16, bias (out, 1) in the epilogue dtype.
    Layer 7:    W^T (1, 8)   bf16, bias (1, 1) f32.
    """
    flat = []
    n = len(params)
    for i, (w, b) in enumerate(params):
        flat.append(w.T.astype(jnp.bfloat16))
        if i < n - 1:
            flat.append(b.reshape(-1, 1).astype(act_dtype))
        else:
            flat.append(b.reshape(1, 1).astype(jnp.float32))
    return flat


def _choose_tiling(B, tile_b_max, num_cores):
    """Pick (tile_b, padded_B, num_tiles): lane-dense tiles, even split on 2-TC chips."""
    b_pad_min = _round_up(max(B, 1), 128)          # lane-dense out + full bf16 packing
    num_tiles = -(-b_pad_min // tile_b_max)
    if num_cores >= 2 and B > 256:
        num_tiles = max(num_tiles, 2)
        if num_tiles % 2:
            num_tiles += 1                          # even work split across both TCs
    tile_b = _round_up(-(-b_pad_min // num_tiles), 128)
    return tile_b, tile_b * num_tiles, num_tiles


def dnn_model_forward(x, params, *, tile_b_max=4096, act_dtype=None):
    """Run the fused MLP kernel. x: (B, len_x) float32. Returns (B,) float32.

    tile_b_max=4096 keeps the double-buffered input tile plus live intermediates
    well under v7x's 64 MiB physical VMEM; on v5e/v6e (128 MiB) it may be raised
    together with vmem_limit_bytes for very large B.
    """
    B, len_x = x.shape
    if act_dtype is None:
        act_dtype = _default_act_dtype()

    tile_b, b_pad, num_tiles = _choose_tiling(B, tile_b_max, _num_tensorcores())

    # Transposed input: batch on lanes.  Zero-padded batch columns produce
    # ReLU(bias-chain) garbage that is sliced off after the call.
    x_t = x.T.astype(jnp.float32)
    if b_pad != B:
        x_t = jnp.pad(x_t, ((0, 0), (0, b_pad - B)))

    flat = pack_params(params, act_dtype)

    # x is tiled over the batch grid; weights/biases are full-array blocks pinned
    # at block index (0, 0) so they are DMA'd once and stay VMEM-resident.
    weight_specs = [pl.BlockSpec(a.shape, lambda i: (0, 0)) for a in flat]
    in_specs = [pl.BlockSpec((len_x, tile_b), lambda i: (0, i))] + weight_specs

    out = pl.pallas_call(
        _make_mlp_kernel(act_dtype),
        out_shape=jax.ShapeDtypeStruct((1, b_pad), jnp.float32),
        grid=(num_tiles,),
        in_specs=in_specs,
        out_specs=pl.BlockSpec((1, tile_b), lambda i: (0, i)),
        compiler_params=pltpu.CompilerParams(
            dimension_semantics=("parallel",)),
    )(x_t, *flat)

    # PyTorch forward does out.view(-1); drop any padded batch columns.
    return out.reshape(-1)[:B]


def init_params(key, len_x):
    """Deterministic init matching nn.Linear shapes (W stored as (in, out), f32)."""
    dims = [len_x, 64, 128, 64, 32, 16, 8, 1]
    params = []
    for i in range(len(dims) - 1):
        fan_in, fan_out = dims[i], dims[i + 1]
        key, kw, kb = jax.random.split(key, 3)
        bound = 1.0 / jnp.sqrt(fan_in)
        w = jax.random.uniform(kw, (fan_in, fan_out), jnp.float32, -bound, bound)
        b = jax.random.uniform(kb, (fan_out,), jnp.float32, -bound, bound)
        params.append((w, b))
    return params


def reference_forward_f32(x, params):
    """Pure f32 plain-JAX reference (module semantics)."""
    h = x
    for i, (w, b) in enumerate(params):
        h = h @ w + b
        if i < len(params) - 1:
            h = jnp.maximum(h, 0.0)
    return h.reshape(-1)


def reference_forward_mirror(x, params, act_dtype=jnp.float32):
    """Plain-JAX reference mirroring the kernel's transposed bf16/f32 math exactly."""
    h = x.T.astype(jnp.float32)
    n = len(params)
    for i, (w, b) in enumerate(params):
        y = jnp.dot(w.T.astype(jnp.bfloat16), h.astype(jnp.bfloat16),
                    preferred_element_type=jnp.float32)
        if i < n - 1:
            y = y.astype(act_dtype) + b.reshape(-1, 1).astype(act_dtype)
            h = jnp.maximum(y, 0)
        else:
            h = y + b.reshape(1, 1)
    return h.reshape(-1).astype(jnp.float32)


if __name__ == "__main__":
    key = jax.random.PRNGKey(0)
    B, LEN_X = 8, 32   # small shapes consistent with the module

    key, kx = jax.random.split(key)
    x = jax.random.normal(kx, (B, LEN_X), jnp.float32)
    params = init_params(key, LEN_X)

    act_dtype = _default_act_dtype()
    out = jax.block_until_ready(dnn_model_forward(x, params, act_dtype=act_dtype))

    assert out.shape == (B,), out.shape
    # Tight check vs. a reference that mirrors the kernel's bf16/f32 numerics.
    ref_mirror = reference_forward_mirror(x, params, act_dtype)
    assert jnp.allclose(out, ref_mirror, atol=2e-3, rtol=2e-3), (out, ref_mirror)
    # Loose sanity check vs. the pure-f32 module semantics (bf16 MXU inputs are a
    # deliberate, reviewer-endorsed precision/perf tradeoff).
    ref_f32 = reference_forward_f32(x, params)
    assert jnp.allclose(out, ref_f32, atol=5e-2, rtol=0.0), (out, ref_f32)
    print("KERNEL_OK")
</pallas_src>

<mosaic_0001>
module attributes {stable_mosaic.version = 11 : i64} {
  func.func @mlp_kernel(%arg0: i32, %arg1: memref<32x128xf32, #tpu.memory_space<vmem>>, %arg2: memref<64x32xbf16, #tpu.memory_space<vmem>>, %arg3: memref<64x1xbf16, #tpu.memory_space<vmem>>, %arg4: memref<128x64xbf16, #tpu.memory_space<vmem>>, %arg5: memref<128x1xbf16, #tpu.memory_space<vmem>>, %arg6: memref<64x128xbf16, #tpu.memory_space<vmem>>, %arg7: memref<64x1xbf16, #tpu.memory_space<vmem>>, %arg8: memref<32x64xbf16, #tpu.memory_space<vmem>>, %arg9: memref<32x1xbf16, #tpu.memory_space<vmem>>, %arg10: memref<16x32xbf16, #tpu.memory_space<vmem>>, %arg11: memref<16x1xbf16, #tpu.memory_space<vmem>>, %arg12: memref<8x16xbf16, #tpu.memory_space<vmem>>, %arg13: memref<8x1xbf16, #tpu.memory_space<vmem>>, %arg14: memref<1x8xbf16, #tpu.memory_space<vmem>>, %arg15: memref<1x1xf32, #tpu.memory_space<vmem>>, %arg16: memref<1x128xf32, #tpu.memory_space<vmem>>) attributes {dimension_semantics = [#tpu.dimension_semantics<parallel>], iteration_bounds = array<i64: 1>, scalar_prefetch = 0 : i64, scratch_operands = 0 : i64, tpu.core_type = #tpu.core_type<tc>, window_params = [{transform_indices = @transform_0, window_bounds = array<i64: 32, 128>}, {pipeline_mode = #tpu.pipeline_mode<synchronous>, transform_indices = @transform_1, window_bounds = array<i64: 64, 32>}, {pipeline_mode = #tpu.pipeline_mode<synchronous>, transform_indices = @transform_2, window_bounds = array<i64: 64, 1>}, {pipeline_mode = #tpu.pipeline_mode<synchronous>, transform_indices = @transform_3, window_bounds = array<i64: 128, 64>}, {pipeline_mode = #tpu.pipeline_mode<synchronous>, transform_indices = @transform_4, window_bounds = array<i64: 128, 1>}, {pipeline_mode = #tpu.pipeline_mode<synchronous>, transform_indices = @transform_5, window_bounds = array<i64: 64, 128>}, {pipeline_mode = #tpu.pipeline_mode<synchronous>, transform_indices = @transform_6, window_bounds = array<i64: 64, 1>}, {pipeline_mode = #tpu.pipeline_mode<synchronous>, transform_indices = @transform_7, window_bounds = array<i64: 32, 64>}, {pipeline_mode = #tpu.pipeline_mode<synchronous>, transform_indices = @transform_8, window_bounds = array<i64: 32, 1>}, {pipeline_mode = #tpu.pipeline_mode<synchronous>, transform_indices = @transform_9, window_bounds = array<i64: 16, 32>}, {pipeline_mode = #tpu.pipeline_mode<synchronous>, transform_indices = @transform_10, window_bounds = array<i64: 16, 1>}, {pipeline_mode = #tpu.pipeline_mode<synchronous>, transform_indices = @transform_11, window_bounds = array<i64: 8, 16>}, {pipeline_mode = #tpu.pipeline_mode<synchronous>, transform_indices = @transform_12, window_bounds = array<i64: 8, 1>}, {pipeline_mode = #tpu.pipeline_mode<synchronous>, transform_indices = @transform_13, window_bounds = array<i64: 1, 8>}, {pipeline_mode = #tpu.pipeline_mode<synchronous>, transform_indices = @transform_14, window_bounds = array<i64: 1, 1>}, {transform_indices = @transform_15, window_bounds = array<i64: 1, 128>}]} {
    %c0 = arith.constant 0 : index
    %c0_0 = arith.constant 0 : index
    %0 = vector.load %arg1[%c0, %c0_0] : memref<32x128xf32, #tpu.memory_space<vmem>>, vector<32x128xf32>
    %c0_1 = arith.constant 0 : index
    %c0_2 = arith.constant 0 : index
    %1 = vector.load %arg2[%c0_1, %c0_2] : memref<64x32xbf16, #tpu.memory_space<vmem>>, vector<64x32xbf16>
    %2 = arith.truncf %0 : vector<32x128xf32> to vector<32x128xbf16>
    %cst = arith.constant dense<0.000000e+00> : vector<64x128xf32>
    %3 = tpu.matmul %1, %2, %cst {dimension_numbers = #tpu.dot_dimension_numbers<[1], [0], [0], [1], [0, 0, 1, 1], [], []>} : vector<64x32xbf16>, vector<32x128xbf16>, vector<64x128xf32> -> vector<64x128xf32>
    %4 = arith.truncf %3 : vector<64x128xf32> to vector<64x128xbf16>
    %c0_3 = arith.constant 0 : index
    %c0_4 = arith.constant 0 : index
    %5 = vector.load %arg3[%c0_3, %c0_4] : memref<64x1xbf16, #tpu.memory_space<vmem>>, vector<64x1xbf16>
    %6 = vector.broadcast %5 : vector<64x1xbf16> to vector<64x128xbf16>
    %7 = arith.addf %4, %6 : vector<64x128xbf16>
    %cst_5 = arith.constant 0.000000e+00 : bf16
    %8 = vector.broadcast %cst_5 : bf16 to vector<64x128xbf16>
    %9 = arith.maximumf %7, %8 : vector<64x128xbf16>
    %c0_6 = arith.constant 0 : index
    %c0_7 = arith.constant 0 : index
    %10 = vector.load %arg4[%c0_6, %c0_7] : memref<128x64xbf16, #tpu.memory_space<vmem>>, vector<128x64xbf16>
    %cst_8 = arith.constant dense<0.000000e+00> : vector<128x128xf32>
    %11 = tpu.matmul %10, %9, %cst_8 {dimension_numbers = #tpu.dot_dimension_numbers<[1], [0], [0], [1], [0, 0, 1, 1], [], []>} : vector<128x64xbf16>, vector<64x128xbf16>, vector<128x128xf32> -> vector<128x128xf32>
    %12 = arith.truncf %11 : vector<128x128xf32> to vector<128x128xbf16>
    %c0_9 = arith.constant 0 : index
    %c0_10 = arith.constant 0 : index
    %13 = vector.load %arg5[%c0_9, %c0_10] : memref<128x1xbf16, #tpu.memory_space<vmem>>, vector<128x1xbf16>
    %14 = vector.broadcast %13 : vector<128x1xbf16> to vector<128x128xbf16>
    %15 = arith.addf %12, %14 : vector<128x128xbf16>
    %cst_11 = arith.constant 0.000000e+00 : bf16
    %16 = vector.broadcast %cst_11 : bf16 to vector<128x128xbf16>
    %17 = arith.maximumf %15, %16 : vector<128x128xbf16>
    %c0_12 = arith.constant 0 : index
    %c0_13 = arith.constant 0 : index
    %18 = vector.load %arg6[%c0_12, %c0_13] : memref<64x128xbf16, #tpu.memory_space<vmem>>, vector<64x128xbf16>
    %cst_14 = arith.constant dense<0.000000e+00> : vector<64x128xf32>
    %19 = tpu.matmul %18, %17, %cst_14 {dimension_numbers = #tpu.dot_dimension_numbers<[1], [0], [0], [1], [0, 0, 1, 1], [], []>} : vector<64x128xbf16>, vector<128x128xbf16>, vector<64x128xf32> -> vector<64x128xf32>
    %20 = arith.truncf %19 : vector<64x128xf32> to vector<64x128xbf16>
    %c0_15 = arith.constant 0 : index
    %c0_16 = arith.constant 0 : index
    %21 = vector.load %arg7[%c0_15, %c0_16] : memref<64x1xbf16, #tpu.memory_space<vmem>>, vector<64x1xbf16>
    %22 = vector.broadcast %21 : vector<64x1xbf16> to vector<64x128xbf16>
    %23 = arith.addf %20, %22 : vector<64x128xbf16>
    %cst_17 = arith.constant 0.000000e+00 : bf16
    %24 = vector.broadcast %cst_17 : bf16 to vector<64x128xbf16>
    %25 = arith.maximumf %23, %24 : vector<64x128xbf16>
    %c0_18 = arith.constant 0 : index
    %c0_19 = arith.constant 0 : index
    %26 = vector.load %arg8[%c0_18, %c0_19] : memref<32x64xbf16, #tpu.memory_space<vmem>>, vector<32x64xbf16>
    %cst_20 = arith.constant dense<0.000000e+00> : vector<32x128xf32>
    %27 = tpu.matmul %26, %25, %cst_20 {dimension_numbers = #tpu.dot_dimension_numbers<[1], [0], [0], [1], [0, 0, 1, 1], [], []>} : vector<32x64xbf16>, vector<64x128xbf16>, vector<32x128xf32> -> vector<32x128xf32>
    %28 = arith.truncf %27 : vector<32x128xf32> to vector<32x128xbf16>
    %c0_21 = arith.constant 0 : index
    %c0_22 = arith.constant 0 : index
    %29 = vector.load %arg9[%c0_21, %c0_22] : memref<32x1xbf16, #tpu.memory_space<vmem>>, vector<32x1xbf16>
    %30 = vector.broadcast %29 : vector<32x1xbf16> to vector<32x128xbf16>
    %31 = arith.addf %28, %30 : vector<32x128xbf16>
    %cst_23 = arith.constant 0.000000e+00 : bf16
    %32 = vector.broadcast %cst_23 : bf16 to vector<32x128xbf16>
    %33 = arith.maximumf %31, %32 : vector<32x128xbf16>
    %c0_24 = arith.constant 0 : index
    %c0_25 = arith.constant 0 : index
    %34 = vector.load %arg10[%c0_24, %c0_25] : memref<16x32xbf16, #tpu.memory_space<vmem>>, vector<16x32xbf16>
    %cst_26 = arith.constant dense<0.000000e+00> : vector<16x128xf32>
    %35 = tpu.matmul %34, %33, %cst_26 {dimension_numbers = #tpu.dot_dimension_numbers<[1], [0], [0], [1], [0, 0, 1, 1], [], []>} : vector<16x32xbf16>, vector<32x128xbf16>, vector<16x128xf32> -> vector<16x128xf32>
    %36 = arith.truncf %35 : vector<16x128xf32> to vector<16x128xbf16>
    %c0_27 = arith.constant 0 : index
    %c0_28 = arith.constant 0 : index
    %37 = vector.load %arg11[%c0_27, %c0_28] : memref<16x1xbf16, #tpu.memory_space<vmem>>, vector<16x1xbf16>
    %38 = vector.broadcast %37 : vector<16x1xbf16> to vector<16x128xbf16>
    %39 = arith.addf %36, %38 : vector<16x128xbf16>
    %cst_29 = arith.constant 0.000000e+00 : bf16
    %40 = vector.broadcast %cst_29 : bf16 to vector<16x128xbf16>
    %41 = arith.maximumf %39, %40 : vector<16x128xbf16>
    %c0_30 = arith.constant 0 : index
    %c0_31 = arith.constant 0 : index
    %42 = vector.load %arg12[%c0_30, %c0_31] : memref<8x16xbf16, #tpu.memory_space<vmem>>, vector<8x16xbf16>
    %cst_32 = arith.constant dense<0.000000e+00> : vector<8x128xf32>
    %43 = tpu.matmul %42, %41, %cst_32 {dimension_numbers = #tpu.dot_dimension_numbers<[1], [0], [0], [1], [0, 0, 1, 1], [], []>} : vector<8x16xbf16>, vector<16x128xbf16>, vector<8x128xf32> -> vector<8x128xf32>
    %44 = arith.truncf %43 : vector<8x128xf32> to vector<8x128xbf16>
    %c0_33 = arith.constant 0 : index
    %c0_34 = arith.constant 0 : index
    %45 = vector.load %arg13[%c0_33, %c0_34] : memref<8x1xbf16, #tpu.memory_space<vmem>>, vector<8x1xbf16>
    %46 = vector.broadcast %45 : vector<8x1xbf16> to vector<8x128xbf16>
    %47 = arith.addf %44, %46 : vector<8x128xbf16>
    %cst_35 = arith.constant 0.000000e+00 : bf16
    %48 = vector.broadcast %cst_35 : bf16 to vector<8x128xbf16>
    %49 = arith.maximumf %47, %48 : vector<8x128xbf16>
    %c0_36 = arith.constant 0 : index
    %c0_37 = arith.constant 0 : index
    %50 = vector.load %arg14[%c0_36, %c0_37] : memref<1x8xbf16, #tpu.memory_space<vmem>>, vector<1x8xbf16>
    %cst_38 = arith.constant dense<0.000000e+00> : vector<1x128xf32>
    %51 = tpu.matmul %50, %49, %cst_38 {dimension_numbers = #tpu.dot_dimension_numbers<[1], [0], [0], [1], [0, 0, 1, 1], [], []>} : vector<1x8xbf16>, vector<8x128xbf16>, vector<1x128xf32> -> vector<1x128xf32>
    %c0_39 = arith.constant 0 : index
    %c0_40 = arith.constant 0 : index
    %52 = vector.load %arg15[%c0_39, %c0_40] : memref<1x1xf32, #tpu.memory_space<vmem>>, vector<1x1xf32>
    %53 = vector.broadcast %52 : vector<1x1xf32> to vector<1x128xf32>
    %54 = arith.addf %51, %53 : vector<1x128xf32>
    %c0_41 = arith.constant 0 : index
    %c0_42 = arith.constant 0 : index
    %55 = vector.load %arg16[%c0_41, %c0_42] : memref<1x128xf32, #tpu.memory_space<vmem>>, vector<1x128xf32>
    tpu.vector_store %arg16[%c0_41, %c0_42], %54 {strides = array<i32>} : memref<1x128xf32, #tpu.memory_space<vmem>>, vector<1x128xf32>,
    return
  }
  func.func @transform_0(%arg0: i32) -> (i32, i32) {
    %c0_i32 = arith.constant 0 : i32
    %c0_i32_0 = arith.constant 0 : i32
    return %c0_i32, %arg0 : i32, i32
  }
  func.func @transform_1(%arg0: i32) -> (i32, i32) {
    %c0_i32 = arith.constant 0 : i32
    %c0_i32_0 = arith.constant 0 : i32
    %c0_i32_1 = arith.constant 0 : i32
    return %c0_i32, %c0_i32_0 : i32, i32
  }
  func.func @transform_2(%arg0: i32) -> (i32, i32) {
    %c0_i32 = arith.constant 0 : i32
    %c0_i32_0 = arith.constant 0 : i32
    %c0_i32_1 = arith.constant 0 : i32
    return %c0_i32, %c0_i32_0 : i32, i32
  }
  func.func @transform_3(%arg0: i32) -> (i32, i32) {
    %c0_i32 = arith.constant 0 : i32
    %c0_i32_0 = arith.constant 0 : i32
    %c0_i32_1 = arith.constant 0 : i32
    return %c0_i32, %c0_i32_0 : i32, i32
  }
  func.func @transform_4(%arg0: i32) -> (i32, i32) {
    %c0_i32 = arith.constant 0 : i32
    %c0_i32_0 = arith.constant 0 : i32
    %c0_i32_1 = arith.constant 0 : i32
    return %c0_i32, %c0_i32_0 : i32, i32
  }
  func.func @transform_5(%arg0: i32) -> (i32, i32) {
    %c0_i32 = arith.constant 0 : i32
    %c0_i32_0 = arith.constant 0 : i32
    %c0_i32_1 = arith.constant 0 : i32
    return %c0_i32, %c0_i32_0 : i32, i32
  }
  func.func @transform_6(%arg0: i32) -> (i32, i32) {
    %c0_i32 = arith.constant 0 : i32
    %c0_i32_0 = arith.constant 0 : i32
    %c0_i32_1 = arith.constant 0 : i32
    return %c0_i32, %c0_i32_0 : i32, i32
  }
  func.func @transform_7(%arg0: i32) -> (i32, i32) {
    %c0_i32 = arith.constant 0 : i32
    %c0_i32_0 = arith.constant 0 : i32
    %c0_i32_1 = arith.constant 0 : i32
    return %c0_i32, %c0_i32_0 : i32, i32
  }
  func.func @transform_8(%arg0: i32) -> (i32, i32) {
    %c0_i32 = arith.constant 0 : i32
    %c0_i32_0 = arith.constant 0 : i32
    %c0_i32_1 = arith.constant 0 : i32
    return %c0_i32, %c0_i32_0 : i32, i32
  }
  func.func @transform_9(%arg0: i32) -> (i32, i32) {
    %c0_i32 = arith.constant 0 : i32
    %c0_i32_0 = arith.constant 0 : i32
    %c0_i32_1 = arith.constant 0 : i32
    return %c0_i32, %c0_i32_0 : i32, i32
  }
  func.func @transform_10(%arg0: i32) -> (i32, i32) {
    %c0_i32 = arith.constant 0 : i32
    %c0_i32_0 = arith.constant 0 : i32
    %c0_i32_1 = arith.constant 0 : i32
    return %c0_i32, %c0_i32_0 : i32, i32
  }
  func.func @transform_11(%arg0: i32) -> (i32, i32) {
    %c0_i32 = arith.constant 0 : i32
    %c0_i32_0 = arith.constant 0 : i32
    %c0_i32_1 = arith.constant 0 : i32
    return %c0_i32, %c0_i32_0 : i32, i32
  }
  func.func @transform_12(%arg0: i32) -> (i32, i32) {
    %c0_i32 = arith.constant 0 : i32
    %c0_i32_0 = arith.constant 0 : i32
    %c0_i32_1 = arith.constant 0 : i32
    return %c0_i32, %c0_i32_0 : i32, i32
  }
  func.func @transform_13(%arg0: i32) -> (i32, i32) {
    %c0_i32 = arith.constant 0 : i32
    %c0_i32_0 = arith.constant 0 : i32
    %c0_i32_1 = arith.constant 0 : i32
    return %c0_i32, %c0_i32_0 : i32, i32
  }
  func.func @transform_14(%arg0: i32) -> (i32, i32) {
    %c0_i32 = arith.constant 0 : i32
    %c0_i32_0 = arith.constant 0 : i32
    %c0_i32_1 = arith.constant 0 : i32
    return %c0_i32, %c0_i32_0 : i32, i32
  }
  func.func @transform_15(%arg0: i32) -> (i32, i32) {
    %c0_i32 = arith.constant 0 : i32
    %c0_i32_0 = arith.constant 0 : i32
    return %c0_i32, %arg0 : i32, i32
  }
}

</mosaic_0001>

<bundles_post_ra>
// kernel: tpu_custom_call.1
= control target key start
LH: loop header
LB: loop body
LE: loop exit
PB: predicated region body
PF: predicated region fallthrough
CT: control target
= control target key end

     0   :  { %s1985_s0 = inlined_call_operand.vmem [shape: f32[32,128], index: 0, kind: input, shape index: {}]   ;;  %s1986_s1 = inlined_call_operand.vmem [shape: bf16[64,32], index: 1, kind: input, shape index: {}]   ;;  %s1987_s2 = inlined_call_operand.vmem [shape: bf16[64,1], index: 2, kind: input, shape index: {}]   ;;  %s1988_s3 = inlined_call_operand.vmem [shape: bf16[128,64], index: 3, kind: input, shape index: {}]   ;;  %s1989_s4 = inlined_call_operand.vmem [shape: bf16[128,1], index: 4, kind: input, shape index: {}]   ;;  %s1990_s5 = inlined_call_operand.vmem [shape: bf16[64,128], index: 5, kind: input, shape index: {}]   ;;  %s1991_s6 = inlined_call_operand.vmem [shape: bf16[64,1], index: 6, kind: input, shape index: {}]   ;;  %s1992_s7 = inlined_call_operand.vmem [shape: bf16[32,64], index: 7, kind: input, shape index: {}]   ;;  %s1993_s8 = inlined_call_operand.vmem [shape: bf16[32,1], index: 8, kind: input, shape index: {}]   ;;  %s1994_s9 = inlined_call_operand.vmem [shape: bf16[16,32], index: 9, kind: input, shape index: {}]   ;;  %s1995_s10 = inlined_call_operand.vmem [shape: bf16[16,1], index: 10, kind: input, shape index: {}]   ;;  %s1996_s11 = inlined_call_operand.vmem [shape: bf16[8,16], index: 11, kind: input, shape index: {}]   ;;  %s1997_s12 = inlined_call_operand.vmem [shape: bf16[8,1], index: 12, kind: input, shape index: {}]   ;;  %s1998_s13 = inlined_call_operand.vmem [shape: bf16[1,8], index: 13, kind: input, shape index: {}]   ;;  %s1999_s14 = inlined_call_operand.<no memory space> [shape: f32[1,1], index: 14, kind: input, shape index: {}]   ;;  %s2000_s15 = inlined_call_operand.hbm [shape: f32[1,128], index: 15, kind: output, shape index: {}]  }
   0x1   :  { %v20_v0 = vstv %s1999_s14 }
   0x2   :  { %21 = vst [vmem:[#allocation2] sm:$0x1] %v20_v0 }
   0x3   :  { %v56_v1 = vld [vmem:[%s1985_s0 + $0x10] sm:$0xff]  ;;  %v57_v2 = vld [vmem:[%s1985_s0 + $0x18] sm:$0xff]  ;;  %v54_v3 = vld [vmem:[%s1985_s0] sm:$0xff]  ;;  %v1599_v6 = vmov 0   ;;  %vm88_vm0 = vcmask 261120  }
   0x4   :  { %v67_v4 = vpack.c.bf16 %v57_v2, %v56_v1  ;;  %v55_v5 = vld [vmem:[%s1985_s0 + $0x8] sm:$0xff]  ;;  %1556 = vset.pattern.permute.xlu0 %v1599_v6  ;;  %v176_v7 = vld [vmem:[%s1987_s2 + $0x18] sm:$0xf]  ;;  %1557 = vset.pattern.permute.xlu1 %v1599_v6  ;;  %v1558_v9 = vld [vmem:[%s1986_s1] sm:$0xff]  }
   0x5   :  { %v66_v8 = vpack.c.bf16 %v55_v5, %v54_v3  ;;  %252 = vperm.xlu0 %1556, %v176_v7   ;;  %v177_v10 = vld [vmem:[%s1987_s2 + $0x1c] sm:$0xf]  ;;  %1463 = vmatprep.mubr.msk.bf16.mxu0 %vm88_vm0, %v1558_v9  ;;  %v174_v11 = vld [vmem:[%s1987_s2 + $0x10] sm:$0xf]  ;;  %v175_v12 = vld [vmem:[%s1987_s2 + $0x14] sm:$0xf] }
   0x6   :  { %1459 = vmatprep.subr.bf16.mxu0 %v67_v4  ;;  %228 = vperm.xlu1 %1557, %v174_v11   ;;  %v1559_v13 = vld [vmem:[%s1986_s1 + $0x8] sm:$0xff]   ;;  %v1560_v15 = vld [vmem:[%s1986_s1 + $0x10] sm:$0xff]   ;;  %v170_v17 = vld [vmem:[%s1987_s2] sm:$0xf] }
   0x7   :  { %1460 = vmatpush3.bf16.msra.mxu0 %v67_v4  ;;  %v172_v14 = vld [vmem:[%s1987_s2 + $0x8] sm:$0xf]  ;;  %v173_v16 = vld [vmem:[%s1987_s2 + $0xc] sm:$0xf]  ;;  %v171_v18 = vld [vmem:[%s1987_s2 + $0x4] sm:$0xf] }
   0x8   :  { %1461 = vmatprep.subr.bf16.mxu0 %v66_v8  ;;  %v1561_v19 = vld [vmem:[%s1986_s1 + $0x18] sm:$0xff]   ;;  %v504_v22 = vld [vmem:[%s1989_s4 + $0x30] sm:$0xf]  ;;  %v505_v23 = vld [vmem:[%s1989_s4 + $0x34] sm:$0xf] }
   0x9   :  { %264 = vperm.xlu0 %1556, %v177_v10   ;;  %v506_v20 = vld [vmem:[%s1989_s4 + $0x38] sm:$0xf]  ;;  %v507_v21 = vld [vmem:[%s1989_s4 + $0x3c] sm:$0xf]  ;;  %v502_v24 = vld [vmem:[%s1989_s4 + $0x28] sm:$0xf] }
   0xa   :  { %240 = vperm.xlu1 %1557, %v175_v12   ;;  %v503_v25 = vld [vmem:[%s1989_s4 + $0x2c] sm:$0xf]  ;;  %v500_v26 = vld [vmem:[%s1989_s4 + $0x20] sm:$0xf] }
   0xb   :  { %1462 = vmatpush3.bf16.msra.mxu0 %v66_v8 }
   0xd   :  { %204 = vperm.xlu0 %1556, %v172_v14  }
   0xe   :  { %1464 = vmatmul.mubr.msk.bf16.vlgmr.msra.gmra.mxu0 %vm88_vm0, %v1559_v13  ;;  %216 = vperm.xlu1 %1557, %v173_v16  }
   0xf   :  { %1467 = vmatprep.mubr.msk.bf16.mxu0 %vm88_vm0, %v1560_v15 }
  0x11   :  { %180 = vperm.xlu0 %1556, %v170_v17  }
  0x12   :  { %192 = vperm.xlu1 %1557, %v171_v18  }
  0x15   :  { %678 = vperm.xlu0 %1556, %v506_v20  }
  0x16   :  { %1468 = vmatmul.mubr.msk.bf16.gmra.mxu0 %vm88_vm0, %v1561_v19  ;;  %690 = vperm.xlu1 %1557, %v507_v21  }
  0x19   :  { %654 = vperm.xlu0 %1556, %v504_v22  }
  0x1a   :  { %666 = vperm.xlu1 %1557, %v505_v23  }
  0x1d   :  { %630 = vperm.xlu0 %1556, %v502_v24  }
  0x1e   :  { %642 = vperm.xlu1 %1557, %v503_v25  }
  0x1f   :  { %22 = vsyncpa [#allocation4], 0  ;;  %v501_v27 = vld [vmem:[%s1989_s4 + $0x24] sm:$0xf]  ;;  %v498_v28 = vld [vmem:[%s1989_s4 + $0x18] sm:$0xf]  ;;  %v186_v57 = vlaneseq }
  0x20   :  { %v499_v29 = vld [vmem:[%s1989_s4 + $0x1c] sm:$0xf]  ;;  %v496_v30 = vld [vmem:[%s1989_s4 + $0x10] sm:$0xf]  ;;  %v497_v31 = vld [vmem:[%s1989_s4 + $0x14] sm:$0xf] }
  0x21   :  { %606 = vperm.xlu0 %1556, %v500_v26   ;;  %v494_v32 = vld [vmem:[%s1989_s4 + $0x8] sm:$0xf]  ;;  %v495_v33 = vld [vmem:[%s1989_s4 + $0xc] sm:$0xf]  ;;  %v492_v34 = vld [vmem:[%s1989_s4] sm:$0xf] }
  0x22   :  { %618 = vperm.xlu1 %1557, %v501_v27   ;;  %v493_v35 = vld [vmem:[%s1989_s4 + $0x4] sm:$0xf]  ;;  %v871_v36 = vld [vmem:[%s1991_s6 + $0x18] sm:$0xf]  ;;  %v872_v37 = vld [vmem:[%s1991_s6 + $0x1c] sm:$0xf] }
  0x23   :  { %v869_v38 = vld [vmem:[%s1991_s6 + $0x10] sm:$0xf]  ;;  %v870_v39 = vld [vmem:[%s1991_s6 + $0x14] sm:$0xf]  ;;  %v867_v40 = vld [vmem:[%s1991_s6 + $0x8] sm:$0xf] }
  0x24   :  { %v868_v41 = vld [vmem:[%s1991_s6 + $0xc] sm:$0xf]  ;;  %v865_v42 = vld [vmem:[%s1991_s6] sm:$0xf]  ;;  %v866_v43 = vld [vmem:[%s1991_s6 + $0x4] sm:$0xf] }
  0x25   :  { %582 = vperm.xlu0 %1556, %v498_v28   ;;  %v1074_v44 = vld [vmem:[%s1993_s8 + $0x8] sm:$0xf]  ;;  %v1075_v45 = vld [vmem:[%s1993_s8 + $0xc] sm:$0xf]  ;;  %v1072_v46 = vld [vmem:[%s1993_s8] sm:$0xf] }
  0x26   :  { %594 = vperm.xlu1 %1557, %v499_v29   ;;  %v1073_v47 = vld [vmem:[%s1993_s8 + $0x4] sm:$0xf]  ;;  %v1192_v48 = vld [vmem:[%s1995_s10] sm:$0xf]  ;;  %vm362_vm1 = vcmask 523264   ;;  %v1838_v61 = vshrl.u32 %v186_v57, 7 }
  0x27   :  { %v1193_v49 = vld [vmem:[%s1995_s10 + $0x4] sm:$0xf]  ;;  %v1272_v50 = vld [vmem:[%s1997_s12] sm:$0xf]  ;;  %v1600_v55 = vmov 839922192  }
  0x28   :  { %v1288_v51 = vld [vmem:[#allocation2] sm:$0x1]  ;;  %v184_v56 = vunpack.c.l.s4 %v1600_v55  ;;  %vm1602_vm2 = vmmov 0   ;;  %vm1227_vm3 = vcmask 130048   ;;  %vm1302_vm4 = vcmask 1043456  }
  0x29   :  { %558 = vperm.xlu0 %1556, %v496_v30   ;;  %v1562_v52 = vld [vmem:[%s1988_s3] sm:$0xff]   ;;  %vm1298_vm5 = vcmask 64512  }
  0x2a   :  { %570 = vperm.xlu1 %1557, %v497_v31   ;;  %1479 = vmatprep.mubr.msk.bf16.mxu1 %vm362_vm1, %v1562_v52  ;;  %v185_v60 = vunpack.c.0.s8 %v184_v56 }
  0x2c   :  { %v1841_v1 = vsub.s32 %v185_v60, %v1838_v61 }
  0x2d   :  { %534 = vperm.xlu0 %1556, %v494_v32  }
  0x2e   :  { %546 = vperm.xlu1 %1557, %v495_v33  }
  0x31   :  { %510 = vperm.xlu0 %1556, %v492_v34  }
  0x32   :  { %522 = vperm.xlu1 %1557, %v493_v35  }
  0x35   :  { %947 = vperm.xlu0 %1556, %v871_v36   ;;  %v1563_v36 = vld [vmem:[%s1988_s3 + $0x8] sm:$0xff]  }
  0x36   :  { %959 = vperm.xlu1 %1557, %v872_v37   ;;  %v1564_v37 = vld [vmem:[%s1988_s3 + $0x10] sm:$0xff]  }
  0x39   :  { %923 = vperm.xlu0 %1556, %v869_v38   ;;  %v1565_v38 = vld [vmem:[%s1988_s3 + $0x18] sm:$0xff]  }
  0x3a   :  { %935 = vperm.xlu1 %1557, %v870_v39   ;;  %v1566_v39 = vld [vmem:[%s1988_s3 + $0x20] sm:$0xff]  }
  0x3d   :  { %899 = vperm.xlu0 %1556, %v867_v40   ;;  %v1567_v40 = vld [vmem:[%s1988_s3 + $0x28] sm:$0xff]  }
  0x3e   :  { %911 = vperm.xlu1 %1557, %v868_v41   ;;  %v1568_v41 = vld [vmem:[%s1988_s3 + $0x30] sm:$0xff]  }
  0x41   :  { %875 = vperm.xlu0 %1556, %v865_v42   ;;  %v1569_v42 = vld [vmem:[%s1988_s3 + $0x38] sm:$0xff]  }
  0x42   :  { %887 = vperm.xlu1 %1557, %v866_v43   ;;  %v1570_v43 = vld [vmem:[%s1990_s5] sm:$0xff]  }
  0x43   :  { %1511 = vmatprep.mubr.bf16.mxu0 %v1570_v43 }
  0x45   :  { %1102 = vperm.xlu0 %1556, %v1074_v44  }
  0x46   :  { %1114 = vperm.xlu1 %1557, %v1075_v45  }
  0x49   :  { %1078 = vperm.xlu0 %1556, %v1072_v46  }
  0x4a   :  { %1090 = vperm.xlu1 %1557, %v1073_v47  }
  0x4d   :  { %1196 = vperm.xlu0 %1556, %v1192_v48  }
  0x4e   :  { %1208 = vperm.xlu1 %1557, %v1193_v49  }
  0x51   :  { %1275 = vperm.xlu0 %1556, %v1272_v50  }
  0x52   :  { %1291 = vperm.xlu1 %1557, %v1288_v51  }
  0x80   :  { %v253_v53 = vpop.permute.xlu0 %252 }
  0x81   :  { %v229_v54 = vpop.permute.xlu1 %228  ;;  %v261_v7 = vrot.slane %v253_v53, %v1841_v1 }
  0x82   :  { %v237_v9 = vrot.slane %v229_v54, %v1841_v1 }
  0x84   :  { %v265_v59 = vpop.permute.xlu0 %264 }
  0x85   :  { %v241_v62 = vpop.permute.xlu1 %240  ;;  %v273_v8 = vrot.slane %v265_v59, %v1841_v1 }
  0x86   :  { %v249_v10 = vrot.slane %v241_v62, %v1841_v1 }
  0x87   :  { %v1372_v15 = vcombine.low %v261_v7, %v273_v8 }
  0x88   :  { %v205_v3 = vpop.permute.xlu0 %204  ;;  %v1371_v18 = vcombine.low %v237_v9, %v249_v10 }
  0x89   :  { %v217_v4 = vpop.permute.xlu1 %216  ;;  %v213_v11 = vrot.slane %v205_v3, %v1841_v1 }
  0x8a   :  { %v225_v12 = vrot.slane %v217_v4, %v1841_v1 }
  0x8c   :  { %v181_v16 = vpop.permute.xlu0 %180  ;;  %v1370_v19 = vcombine.low %v213_v11, %v225_v12 }
  0x8d   :  { %v189_v20 = vrot.slane %v181_v16, %v1841_v1  ;;  %v193_v21 = vpop.permute.xlu1 %192 }
  0x8e   :  { %v201_v23 = vrot.slane %v193_v21, %v1841_v1 }
  0x90   :  { %v1369_v29 = vcombine.low %v189_v20, %v201_v23  ;;  %v679_v47 = vpop.permute.xlu0 %678 }
  0x91   :  { %v691_v48 = vpop.permute.xlu1 %690  ;;  %v687_v3 = vrot.slane %v679_v47, %v1841_v1 }
  0x92   :  { %v699_v4 = vrot.slane %v691_v48, %v1841_v1 }
  0x94   :  { %v655_v52 = vpop.permute.xlu0 %654  ;;  %v1396_v10 = vcombine.low %v687_v3, %v699_v4  ;;  %v1571_v3 = vld [vmem:[%s1990_s5 + $0x8] sm:$0xff]   ;;  %v1574_v4 = vld [vmem:[%s1992_s7] sm:$0xff]  }
  0x95   :  { %v667_v53 = vpop.permute.xlu1 %666  ;;  %v663_v7 = vrot.slane %v655_v52, %v1841_v1 }
  0x96   :  { %v675_v8 = vrot.slane %v667_v53, %v1841_v1 }
  0x98   :  { %v631_v57 = vpop.permute.xlu0 %630 }
  0x99   :  { %v639_v11 = vrot.slane %v631_v57, %v1841_v1 }
  0xce   :  { %v1465_v58 = vpop.f32.mrf.mxu0 }
  0xd0   :  { %v135_v63 = vpop.f32.mrf.mxu0 }
  0xd2   :  { %v1466_v0 = vpop.f32.mrf.mxu0 }
  0xd3   :  { %v167_v24 = vpack.c.bf16 %v1466_v0, %v1465_v58  ;;  %v643_v58 = vpop.permute.xlu1 %642 }
  0xd4   :  { %v138_v2 = vpop.f32.mrf.mxu0  ;;  %v651_v12 = vrot.slane %v643_v58, %v1841_v1 }
  0xd5   :  { %v299_v30 = vadd.bf16 %v1370_v19, %v167_v24  ;;  %v166_v31 = vpack.c.bf16 %v138_v2, %v135_v63  ;;  %v607_v63 = vpop.permute.xlu0 %606 }
  0xd6   :  { %v1469_v5 = vpop.f32.mrf.mxu0  ;;  %v615_v21 = vrot.slane %v607_v63, %v1841_v1 }
  0xd7   :  { %v298_v33 = vadd.bf16 %v1369_v29, %v166_v31  ;;  %v303_v34 = vmax.bf16 %v1599_v6, %v299_v30  ;;  %v619_v0 = vpop.permute.xlu1 %618 }
  0xd8   :  { %v151_v13 = vpop.f32.mrf.mxu0  ;;  %v627_v23 = vrot.slane %v619_v0, %v1841_v1 }
  0xd9   :  { %v302_v35 = vmax.bf16 %v1599_v6, %v298_v33 }
  0xda   :  { %v1470_v14 = vpop.f32.mrf.mxu0  ;;  %v1393_v31 = vcombine.low %v615_v21, %v627_v23 }
  0xdb   :  { %v169_v17 = vpack.c.bf16 %v1470_v14, %v1469_v5 }
  0xdc   :  { %v154_v22 = vpop.f32.mrf.mxu0 }
  0xdd   :  { %v301_v25 = vadd.bf16 %v1372_v15, %v169_v17  ;;  %v168_v26 = vpack.c.bf16 %v154_v22, %v151_v13  ;;  %v583_v13 = vpop.permute.xlu0 %582  ;;  %v595_v15 = vpop.permute.xlu1 %594  ;;  %v1395_v17 = vcombine.low %v663_v7, %v675_v8  ;;  %v1394_v22 = vcombine.low %v639_v11, %v651_v12 }
  0xde   :  { %v603_v33 = vrot.slane %v595_v15, %v1841_v1 }
  0xdf   :  { %v300_v27 = vadd.bf16 %v1371_v18, %v168_v26  ;;  %v305_v28 = vmax.bf16 %v1599_v6, %v301_v25 }
  0xe1   :  { %1471 = vmatprep.subr.bf16.mxu1 %v305_v28  ;;  %v304_v32 = vmax.bf16 %v1599_v6, %v300_v27  ;;  %v559_v29 = vpop.permute.xlu0 %558  ;;  %v571_v30 = vpop.permute.xlu1 %570 }
  0xe2   :  { %1472 = vmatpush3.bf16.msra.mxu1 %v305_v28 }
  0xe3   :  { %1473 = vmatprep.subr.bf16.mxu1 %v304_v32 }
  0xe6   :  { %1474 = vmatpush3.bf16.msra.mxu1 %v304_v32  ;;  %v591_v32 = vrot.slane %v583_v13, %v1841_v1 }
  0xe7   :  { %1475 = vmatprep.subr.bf16.mxu1 %v303_v34 }
  0xea   :  { %1476 = vmatpush3.bf16.msra.mxu1 %v303_v34 }
  0xeb   :  { %1477 = vmatprep.subr.bf16.mxu1 %v302_v35 }
  0xee   :  { %1478 = vmatpush3.bf16.msra.mxu1 %v302_v35 }
  0xf1   :  { %1480 = vmatmul.mubr.msk.bf16.vlgmr.msra.gmra.mxu1 %vm362_vm1, %v1563_v36 }
  0xf2   :  { %1483 = vmatprep.mubr.msk.bf16.mxu1 %vm362_vm1, %v1564_v37  ;;  %v1392_v37 = vcombine.low %v591_v32, %v603_v33 }
  0xf9   :  { %1484 = vmatmul.mubr.msk.bf16.gmra.mxu1 %vm362_vm1, %v1565_v38  ;;  %v567_v38 = vrot.slane %v559_v29, %v1841_v1 }
  0xfa   :  { %1487 = vmatprep.mubr.msk.bf16.mxu1 %vm362_vm1, %v1566_v39  ;;  %v579_v39 = vrot.slane %v571_v30, %v1841_v1 }
  0xfc   :  { %v1391_v48 = vcombine.low %v567_v38, %v579_v39 }
 0x101   :  { %1488 = vmatmul.mubr.msk.bf16.gmra.mxu1 %vm362_vm1, %v1567_v40  ;;  %v535_v40 = vpop.permute.xlu0 %534 }
 0x102   :  { %1491 = vmatprep.mubr.msk.bf16.mxu1 %vm362_vm1, %v1568_v41  ;;  %v547_v41 = vpop.permute.xlu1 %546 }
 0x103   :  { %v555_v52 = vrot.slane %v547_v41, %v1841_v1 }
 0x105   :  { %v511_v57 = vpop.permute.xlu0 %510 }
 0x106   :  { %v523_v58 = vpop.permute.xlu1 %522 }
 0x109   :  { %1492 = vmatmul.mubr.msk.bf16.gmra.mxu1 %vm362_vm1, %v1569_v42 }
 0x10a   :  { %1527 = vmatprep.mubr.msk.bf16.mxu1 %vm362_vm1, %v1574_v4  ;;  %v960_v7 = vpop.permute.xlu1 %959 }
 0x10e   :  { %v936_v11 = vpop.permute.xlu1 %935 }
 0x10f   :  { %v944_v21 = vrot.slane %v936_v11, %v1841_v1 }
 0x1b1   :  { %v1886_v44 = vpop.f32.mrf.mxu1 }
 0x1b3   :  { %v1888_v45 = vpop.f32.mrf.mxu1 }
 0x1b5   :  { %v1890_v46 = vpop.f32.mrf.mxu1 }
 0x1b6   :  { %v485_v53 = vpack.c.bf16 %v1890_v46, %v1886_v44 }
 0x1b7   :  { %v1892_v49 = vpop.f32.mrf.mxu1 }
 0x1b9   :  { %v1485_v50 = vpop.f32.mrf.mxu1 }
 0x1bb   :  { %v1894_v51 = vpop.f32.mrf.mxu1 }
 0x1bd   :  { %v1486_v54 = vpop.f32.mrf.mxu1 }
 0x1be   :  { %v487_v34 = vpack.c.bf16 %v1486_v54, %v1485_v50  ;;  %v543_v50 = vrot.slane %v535_v40, %v1841_v1 }
 0x1bf   :  { %v1896_v55 = vpop.f32.mrf.mxu1 }
 0x1c0   :  { %v751_v42 = vadd.bf16 %v1392_v37, %v487_v34  ;;  %v486_v43 = vpack.c.bf16 %v1896_v55, %v1894_v51  ;;  %v519_v51 = vrot.slane %v511_v57, %v1841_v1  ;;  %v531_v55 = vrot.slane %v523_v58, %v1841_v1 }
 0x1c1   :  { %v1489_v56 = vpop.f32.mrf.mxu1 }
 0x1c2   :  { %v750_v54 = vadd.bf16 %v1391_v48, %v486_v43  ;;  %v1389_v44 = vcombine.low %v519_v51, %v531_v55 }
 0x1c3   :  { %v453_v59 = vpop.f32.mrf.mxu1 }
 0x1c4   :  { %v758_v63 = vmax.bf16 %v1599_v6, %v750_v54 }
 0x1c5   :  { %v1490_v60 = vpop.f32.mrf.mxu1 }
 0x1c6   :  { %v489_v18 = vpack.c.bf16 %v1490_v60, %v1489_v56  ;;  %v759_v56 = vmax.bf16 %v1599_v6, %v751_v42 }
 0x1c7   :  { %v456_v62 = vpop.f32.mrf.mxu1 }
 0x1c8   :  { %v753_v26 = vadd.bf16 %v1394_v22, %v489_v18  ;;  %v488_v27 = vpack.c.bf16 %v456_v62, %v453_v59  ;;  %v1390_v59 = vcombine.low %v543_v50, %v555_v52  ;;  %v484_v62 = vpack.c.bf16 %v1892_v49, %v1888_v45  ;;  %v1572_v45 = vld [vmem:[%s1990_s5 + $0x10] sm:$0xff]   ;;  %v1573_v49 = vld [vmem:[%s1990_s5 + $0x18] sm:$0xff]   ;;  %v912_v18 = vpop.permute.xlu1 %911  ;;  %v1575_v50 = vld [vmem:[%s1992_s7 + $0x8] sm:$0xff]  }
 0x1c9   :  { %v1493_v2 = vpop.f32.mrf.mxu1  ;;  %v1601_v52 = vmov 0.0  }
 0x1ca   :  { %v752_v35 = vadd.bf16 %v1393_v31, %v488_v27  ;;  %v761_v36 = vmax.bf16 %v1599_v6, %v753_v26  ;;  %v749_v60 = vadd.bf16 %v1390_v59, %v485_v53  ;;  %v748_v46 = vadd.bf16 %v1389_v44, %v484_v62 }
 0x1cb   :  { %v469_v5 = vpop.f32.mrf.mxu1 }
 0x1cc   :  { %v760_v47 = vmax.bf16 %v1599_v6, %v752_v35  ;;  %v757_v0 = vmax.bf16 %v1599_v6, %v749_v60  ;;  %v888_v34 = vpop.permute.xlu1 %887 }
 0x1cd   :  { %v1494_v9 = vpop.f32.mrf.mxu1 }
 0x1ce   :  { %v491_v14 = vpack.c.bf16 %v1494_v9, %v1493_v2  ;;  %v756_v2 = vmax.bf16 %v1599_v6, %v748_v46 }
 0x1cf   :  { %v472_v16 = vpop.f32.mrf.mxu1 }
 0x1d0   :  { %v755_v19 = vadd.bf16 %v1396_v10, %v491_v14  ;;  %v490_v20 = vpack.c.bf16 %v472_v16, %v469_v5  ;;  %v948_v5 = vpop.permute.xlu0 %947  ;;  %v968_v16 = vrot.slane %v960_v7, %v1841_v1  ;;  %v1115_v54 = vpop.permute.xlu1 %1114  ;;  %v1576_v7 = vld [vmem:[%s1994_s9] sm:$0xff]  }
 0x1d1   :  { %v956_v15 = vrot.slane %v948_v5, %v1841_v1  ;;  %v1123_v58 = vrot.slane %v1115_v54, %v1841_v1 }
 0x1d2   :  { %v754_v24 = vadd.bf16 %v1395_v17, %v490_v20  ;;  %v763_v25 = vmax.bf16 %v1599_v6, %v755_v19 }
 0x1d3   :  { %v1404_v23 = vcombine.low %v956_v15, %v968_v16 }
 0x1d4   :  { %1495 = vmatprep.subr.bf16.mxu0 %v763_v25  ;;  %v762_v28 = vmax.bf16 %v1599_v6, %v754_v24  ;;  %v924_v10 = vpop.permute.xlu0 %923  ;;  %v1091_v51 = vpop.permute.xlu1 %1090 }
 0x1d5   :  { %1496 = vmatpush3.bf16.msra.mxu0 %v763_v25  ;;  %v932_v20 = vrot.slane %v924_v10, %v1841_v1  ;;  %v920_v25 = vrot.slane %v912_v18, %v1841_v1  ;;  %v1099_v62 = vrot.slane %v1091_v51, %v1841_v1 }
 0x1d6   :  { %1497 = vmatprep.subr.bf16.mxu0 %v762_v28 }
 0x1d8   :  { %v900_v17 = vpop.permute.xlu0 %899 }
 0x1d9   :  { %1498 = vmatpush3.bf16.msra.mxu0 %v762_v28  ;;  %v908_v24 = vrot.slane %v900_v17, %v1841_v1  ;;  %v1403_v28 = vcombine.low %v932_v20, %v944_v21  ;;  %v1226_v20 = vld [vmem:[%s1996_s11] sm:$0xf]  ;;  %s1603_s11 = smov [#allocation3]  }
 0x1da   :  { %1499 = vmatprep.subr.bf16.mxu0 %v761_v36  ;;  %s1353_s23 = sshll.u32 %s1603_s11, 4  ;;  %s1354_s23 = int_to_ptr.vmem [resolvable:$true] %s1353_s23 }
 0x1db   :  { %v1402_v35 = vcombine.low %v908_v24, %v920_v25  ;;  %s1577_s2 = scalar_lea.vmem %s1354_s23, 16  ;;  %s1581_s24 = scalar_lea.vmem %s1354_s23, 32 }
 0x1dc   :  { %v876_v29 = vpop.permute.xlu0 %875  ;;  %p1578_p0 = scmp.ne.s32.totalorder %s1354_s23, %s1577_s2  ;;  %p1582_p1 = scmp.lt.s32.totalorder %s1354_s23, %s1354_s23 }
 0x1dd   :  { %1500 = vmatpush3.bf16.msra.mxu0 %v761_v36  ;;  %v884_v33 = vrot.slane %v876_v29, %v1841_v1  ;;  %v896_v36 = vrot.slane %v888_v34, %v1841_v1  ;;  %p1583_p2 = scmp.lt.s32.totalorder %s1581_s24, %s1577_s2 }
 0x1de   :  { %1501 = vmatprep.subr.bf16.mxu0 %v760_v47 }
 0x1df   :  { %v1401_v42 = vcombine.low %v884_v33, %v896_v36  ;;  %p1584_p3 = por %p1583_p2, %p1582_p1 }
 0x1e0   :  { %v1103_v53 = vpop.permute.xlu0 %1102 }
 0x1e1   :  { %1502 = vmatpush3.bf16.msra.mxu0 %v760_v47  ;;  %v1111_v57 = vrot.slane %v1103_v53, %v1841_v1  ;;  %p1585_p4 = pnand %p1584_p3, %p1578_p0 }
 0x1e2   :  { %1503 = vmatprep.subr.bf16.mxu0 %v759_v56 }
 0x1e3   :  { %v1410_v44 = vcombine.low %v1111_v57, %v1123_v58 }
 0x1e4   :  { %v1079_v59 = vpop.permute.xlu0 %1078 }
 0x1e5   :  { %1504 = vmatpush3.bf16.msra.mxu0 %v759_v56  ;;  %v1087_v60 = vrot.slane %v1079_v59, %v1841_v1 }
 0x1e6   :  { %1505 = vmatprep.subr.bf16.mxu0 %v758_v63 }
 0x1e9   :  { %1506 = vmatpush3.bf16.msra.mxu0 %v758_v63 }
 0x1ea   :  { %1507 = vmatprep.subr.bf16.mxu0 %v757_v0 }
 0x1ed   :  { %1508 = vmatpush3.bf16.msra.mxu0 %v757_v0 }
 0x1ee   :  { %1509 = vmatprep.subr.bf16.mxu0 %v756_v2 }
 0x1f1   :  { %1510 = vmatpush3.bf16.msra.mxu0 %v756_v2  ;;  %v1409_v2 = vcombine.low %v1087_v60, %v1099_v62 }
 0x1f2   :  { %1531 = vmatprep.subr.bf16.mxu0 %v1601_v52 }
 0x1f4   :  { %1512 = vmatmul.mubr.bf16.vlgmr.msra.gmra.mxu0 %v1571_v3 }
 0x1f5   :  { %1515 = vmatprep.mubr.bf16.mxu0 %v1572_v45 }
 0x1fc   :  { %1516 = vmatmul.mubr.bf16.gmra.mxu0 %v1573_v49 }
 0x1fd   :  { %1535 = vmatprep.mubr.msk.bf16.mxu0 %vm1602_vm2, %v1601_v52 }
 0x2b4   :  { %v1513_v8 = vpop.f32.mrf.mxu0 }
 0x2b6   :  { %v830_v9 = vpop.f32.mrf.mxu0 }
 0x2b8   :  { %v1514_v12 = vpop.f32.mrf.mxu0 }
 0x2b9   :  { %v862_v30 = vpack.c.bf16 %v1514_v12, %v1513_v8  ;;  %v1209_v8 = vpop.permute.xlu1 %1208 }
 0x2ba   :  { %v833_v13 = vpop.f32.mrf.mxu0  ;;  %v1217_v12 = vrot.slane %v1209_v8, %v1841_v1 }
 0x2bb   :  { %v994_v39 = vadd.bf16 %v1402_v35, %v862_v30  ;;  %v861_v40 = vpack.c.bf16 %v833_v13, %v830_v9  ;;  %v1197_v9 = vpop.permute.xlu0 %1196 }
 0x2bc   :  { %v1517_v14 = vpop.f32.mrf.mxu0  ;;  %v1205_v11 = vrot.slane %v1197_v9, %v1841_v1 }
 0x2bd   :  { %v993_v43 = vadd.bf16 %v1401_v42, %v861_v40  ;;  %v998_v47 = vmax.bf16 %v1599_v6, %v994_v39  ;;  %v1292_v33 = vpop.permute.xlu1 %1291 }
 0x2be   :  { %v846_v19 = vpop.f32.mrf.mxu0  ;;  %v1413_v15 = vcombine.low %v1205_v11, %v1217_v12 }
 0x2bf   :  { %v997_v48 = vmax.bf16 %v1599_v6, %v993_v43  ;;  %v1276_v21 = vpop.permute.xlu0 %1275 }
 0x2c0   :  { %v1518_v22 = vpop.f32.mrf.mxu0 }
 0x2c1   :  { %v864_v26 = vpack.c.bf16 %v1518_v22, %v1517_v14 }
 0x2c2   :  { %v849_v27 = vpop.f32.mrf.mxu0 }
 0x2c3   :  { %v996_v31 = vadd.bf16 %v1404_v23, %v864_v26  ;;  %v863_v32 = vpack.c.bf16 %v849_v27, %v846_v19  ;;  %v1284_v23 = vrot.slane %v1276_v21, %v1841_v1 }
 0x2c5   :  { %v995_v37 = vadd.bf16 %v1403_v28, %v863_v32  ;;  %v1000_v38 = vmax.bf16 %v1599_v6, %v996_v31  ;;  %v1287_v31 = vld [vmem:[%s1998_s13] sm:$0x1]  ;;  %v1296_v32 = vsub.s32 0, %v1838_v61 }
 0x2c7   :  { %1519 = vmatprep.subr.bf16.mxu1 %v1000_v38  ;;  %v999_v41 = vmax.bf16 %v1599_v6, %v995_v37  ;;  %v1297_v1 = vrot.slane %v1292_v33, %v1296_v32 }
 0x2c8   :  { %1520 = vmatpush3.bf16.msra.mxu1 %v1000_v38 }
 0x2c9   :  { %1521 = vmatprep.subr.bf16.mxu1 %v999_v41 }
 0x2cc   :  { %1522 = vmatpush3.bf16.msra.mxu1 %v999_v41 }
 0x2cd   :  { %1523 = vmatprep.subr.bf16.mxu1 %v998_v47 }
 0x2d0   :  { %1524 = vmatpush3.bf16.msra.mxu1 %v998_v47 }
 0x2d1   :  { %1525 = vmatprep.subr.bf16.mxu1 %v997_v48 }
 0x2d4   :  { %1526 = vmatpush3.bf16.msra.mxu1 %v997_v48 }
 0x2d5   :  { %1539 = vmatprep.subr.bf16.mxu1 %v1601_v52 }
 0x2d7   :  { %1528 = vmatmul.mubr.msk.bf16.vlgmr.msra.gmra.mxu1 %vm362_vm1, %v1575_v50 }
 0x2d8   :  { %1541 = vmatprep.mubr.msk.bf16.mxu1 %vm1602_vm2, %v1601_v52 }
 0x397   :  { %v1529_v56 = vpop.f32.mrf.mxu1 }
 0x399   :  { %v1055_v55 = vpop.f32.mrf.mxu1 }
 0x39b   :  { %v1530_v63 = vpop.f32.mrf.mxu1 }
 0x39c   :  { %v1071_v46 = vpack.c.bf16 %v1530_v63, %v1529_v56 }
 0x39d   :  { %v1058_v0 = vpop.f32.mrf.mxu1 }
 0x39e   :  { %v1137_v3 = vadd.bf16 %v1410_v44, %v1071_v46  ;;  %v1070_v45 = vpack.c.bf16 %v1058_v0, %v1055_v55 }
 0x3a0   :  { %v1139_v49 = vmax.bf16 %v1599_v6, %v1137_v3  ;;  %v1136_v4 = vadd.bf16 %v1409_v2, %v1070_v45 }
 0x3a2   :  { %1532 = vmatpush3.bf16.msra.mxu0 %v1139_v49  ;;  %v1138_v5 = vmax.bf16 %v1599_v6, %v1136_v4 }
 0x3a3   :  { %1533 = vmatprep.subr.bf16.mxu0 %v1601_v52 }
 0x3a6   :  { %1534 = vmatpush3.bf16.msra.mxu0 %v1138_v5 }
 0x3a7   :  { %1545 = vmatprep.subr.bf16.mxu0 %v1601_v52 }
 0x3a9   :  { %1536 = vmatmul.mubr.msk.bf16.vlgmr.msra.gmra.mxu0 %vm88_vm0, %v1576_v7 }
 0x3aa   :  { %1547 = vmatprep.mubr.msk.bf16.mxu0 %vm1602_vm2, %v1601_v52 }
 0x469   :  { %v1184_v10 = vpop.f32.mrf.mxu0 }
 0x46b   :  { %v1537_v13 = vpop.f32.mrf.mxu0 }
 0x46d   :  { %v1187_v14 = vpop.f32.mrf.mxu0 }
 0x46e   :  { %v1191_v16 = vpack.c.bf16 %v1187_v14, %v1184_v10 }
 0x46f   :  { %v1538_v17 = vpop.f32.mrf.mxu0 }
 0x470   :  { %v1224_v18 = vadd.bf16 %v1413_v15, %v1191_v16 }
 0x472   :  { %v1225_v19 = vmax.bf16 %v1599_v6, %v1224_v18 }
 0x474   :  { %1540 = vmatpush3.bf16.msra.mxu1 %v1225_v19 }
 0x477   :  { %1542 = vmatmul.mubr.msk.bf16.vlgmr.msra.gmra.mxu1 %vm1227_vm3, %v1226_v20 }
 0x537   :  { %v1265_v22 = vpop.f32.mrf.mxu1 }
 0x538   :  { %v1271_v24 = vpack.c.bf16 %v1265_v22, %v1265_v22 }
 0x539   :  { %v1543_v25 = vpop.f32.mrf.mxu1 }
 0x53a   :  { %v1285_v26 = vadd.bf16 %v1284_v23, %v1271_v24 }
 0x53b   :  { %v1268_v27 = vpop.f32.mrf.mxu1 }
 0x53c   :  { %v1286_v28 = vmax.bf16 %v1599_v6, %v1285_v26 }
 0x53d   :  { %v1544_v29 = vpop.f32.mrf.mxu1 }
 0x53e   :  { %v1304_v30 = vsel %vm1302_vm4, %v1286_v28, 0 }
 0x53f   :  { %1546 = vmatpush3.bf16.msra.mxu0 %v1304_v30 }
 0x542   :  { %1548 = vmatmul.mubr.msk.bf16.vlgmr.msra.gmra.mxu0 %vm1298_vm5, %v1287_v31 }
 0x602   :  { %v1340_v34 = vpop.f32.mrf.mxu0 }
 0x603   :  { %v1341_v35 = vadd.f32 %v1340_v34, %v1297_v1 }
 0x604   :  { %v1549_v36 = vpop.f32.mrf.mxu0 }
 0x605   :  { %1346 = vst [vmem:[#allocation3] sm:$0x1] %v1341_v35 }
 0x606   :  { %v1343_v6 = vpop.f32.mrf.mxu0 }
 0x607   :  { %1588 = shalt.err (!%p1585_p4)
}
 0x608   :  { %1356 = dma.vmem_to_hbm [thread:$0]  %s1354_s23, 16, %s2000_s15, [#allocation4]   ;;  %v1550_v61 = vpop.f32.mrf.mxu0 }
 0x609   :  { %1597 = dma.done.wait [#allocation4], 16  }
 0x60a   :  { %1598 = vsyncadd [#allocation4], 4294967280 }
 0x60b   :  { %1360 = vsyncpa [#allocation4], 1 }

</bundles_post_ra>
